<compile_context>
chip_gen: v6e
topology: v6e:2x2x1
jax: 0.10.0
libtpu: 0.0.40
codegen_flags: <defaults>
</compile_context>

<pallas_src>
from functools import partial as _partial

import jax
import jax.numpy as jnp
from jax.experimental import pallas as pl
from jax.experimental.pallas import tpu as pltpu


# ----------------------------- helpers (verbatim semantics) ------------------

def exists(val):
    return val is not None


def default(val, d):
    return val if exists(val) else d


def accum_log(log, new_logs):
    for key, new_value in new_logs.items():
        old_value = log.get(key, 0.0)
        log[key] = old_value + new_value
    return log


# ----------------------------- tiling helpers ---------------------------------

def _round_up(x, m):
    return ((x + m - 1) // m) * m


def _pick_tiling(n_rows, tm_max=512):
    # Pad stacked M so the MXU sees >=128 rows; keep everything as one block
    # when it fits, otherwise tile by tm_max (>=512 rows/block reaches ~85% of
    # HBM roofline on v5e/v6e and still double-buffers within v7x's 64 MiB VMEM
    # at these feature dims).
    if n_rows <= tm_max:
        m_pad = max(128, _round_up(n_rows, 8))
        return m_pad, m_pad
    return _round_up(n_rows, tm_max), tm_max


# ----------------------------- Pallas kernel ----------------------------------

def _bce_with_logits(x, y):
    # numerically stable BCE-with-logits (f32 VPU/EUP math; log1p for precision)
    return jnp.maximum(x, 0.0) - x * y + jnp.log1p(jnp.exp(-jnp.abs(x)))


def stats_kernel(seq_ref, yr_ref, w1_ref, wh_ref, out_ref, *, n_rows, tm):
    """Per-block partial sums for the Trainer losses.

    seq_ref: (TM, F) bf16 one-hot block
    yr_ref : (TM, 2) f32 packed [binary_target | read_value]
    w1_ref : (F, H) bf16   (resident across the grid)
    wh_ref : (H, 2) f32 fused [w2 | w3] head (resident)
    out_ref: (1, 128) f32 lane-dense partial-sums row:
             lane 0 = sum BCE, lane 1 = sum squared-error, lane 2 = sum correct
    """
    # (TM, F)bf16 @ (F, H)bf16 -> f32 on the MXU; activations stay f32 after.
    h = jnp.dot(seq_ref[...], w1_ref[...], preferred_element_type=jnp.float32)
    h = jnp.maximum(h, 0.0)                                          # (TM, H) f32
    # fused heads: single (TM, H)@(H, 2) f32 matmul; col 0 = logits, col 1 = read_pred
    heads = jnp.dot(h, wh_ref[...], preferred_element_type=jnp.float32)

    yr = yr_ref[...]                                                 # (TM, 2) f32
    row0 = pl.program_id(0) * tm
    rows = jax.lax.broadcasted_iota(jnp.int32, heads.shape, 0) + row0
    cols = jax.lax.broadcasted_iota(jnp.int32, heads.shape, 1)
    valid = rows < n_rows                                            # mask padded rows

    bce = _bce_with_logits(heads, yr)                                # col 0 meaningful
    se = (heads - yr) ** 2                                           # col 1 meaningful
    # (sigmoid(x) > 0.5) == (x > 0); targets are exactly 0.0 / 1.0
    correct = ((heads > 0.0) == (yr > 0.5)).astype(jnp.float32)      # col 0 meaningful

    zeros = jnp.zeros_like(heads)
    bce_sum = jnp.sum(jnp.where(valid & (cols == 0), bce, zeros))
    mse_sum = jnp.sum(jnp.where(valid & (cols == 1), se, zeros))
    acc_sum = jnp.sum(jnp.where(valid & (cols == 0), correct, zeros))

    lane = jax.lax.broadcasted_iota(jnp.int32, out_ref.shape, 1)
    out_ref[...] = jnp.where(lane == 0, bce_sum,
                   jnp.where(lane == 1, mse_sum,
                   jnp.where(lane == 2, acc_sum, 0.0)))


def _stats_pallas(seq, yr, w1, wh, *, n_rows, tm):
    m_pad, feat = seq.shape
    hdim = w1.shape[1]
    n_blocks = m_pad // tm
    kernel = _partial(stats_kernel, n_rows=n_rows, tm=tm)
    return pl.pallas_call(
        kernel,
        grid=(n_blocks,),
        in_specs=[
            pl.BlockSpec((tm, feat), lambda i: (i, 0)),
            pl.BlockSpec((tm, 2), lambda i: (i, 0)),
            pl.BlockSpec((feat, hdim), lambda i: (0, 0)),   # weights resident
            pl.BlockSpec((hdim, 2), lambda i: (0, 0)),
        ],
        out_specs=pl.BlockSpec((1, 128), lambda i: (i, 0)),
        out_shape=jax.ShapeDtypeStruct((n_blocks, 128), jnp.float32),
        compiler_params=pltpu.CompilerParams(
            dimension_semantics=("parallel",)),   # v7x: both TensorCores
    )(seq, yr, w1, wh)


@_partial(jax.jit, static_argnames=("n_rows", "tm"))
def train_step(seq, yr, w1, wh, *, n_rows, tm):
    partial_sums = _stats_pallas(seq, yr, w1, wh, n_rows=n_rows, tm=tm)
    sums = jnp.sum(partial_sums, axis=0)            # tiny XLA epilogue
    inv_n = 1.0 / n_rows
    loss = sums[0] * inv_n                          # stacked masked mean == sum_i mean_i / GA
    aux = sums[1] * inv_n
    return loss, aux, loss + aux                    # combine_losses


@_partial(jax.jit,
          static_argnames=("n_train_rows", "n_valid_rows", "tm_train", "tm_valid"))
def train_and_valid_step(seq, yr, vseq, vyr, w1, wh, *,
                         n_train_rows, n_valid_rows, tm_train, tm_valid):
    tp = _stats_pallas(seq, yr, w1, wh, n_rows=n_train_rows, tm=tm_train)
    vp = _stats_pallas(vseq, vyr, w1, wh, n_rows=n_valid_rows, tm=tm_valid)
    tsums = jnp.sum(tp, axis=0)
    vsums = jnp.sum(vp, axis=0)
    loss = tsums[0] / n_train_rows
    aux = tsums[1] / n_train_rows
    vloss = vsums[0] / n_valid_rows
    vacc = vsums[2] / n_valid_rows
    return loss, aux, loss + aux, vloss, vacc


# ----------------------------- Trainer wrapper --------------------------------

class TrainerForward:
    """Python-side reproduction of Trainer.forward's accumulation logic; all
    per-step tensor math runs in Pallas kernels over the stacked grad-accum
    micro-batches.  Log values stay on-device; the only host sync is the
    (rare) print."""

    def __init__(self, params, *, grad_accum_every=1, validate_every=250,
                 print_every=50):
        w1, w2, w3 = params
        # Weights cached ONCE in their kernel dtypes (no per-step convert):
        #   w1 -> bf16 (the one-hot operand is exact in bf16; standard mixed precision)
        #   wh -> fused (H, 2) head kept in f32 so activations never drop below f32
        self.w1 = jnp.asarray(w1, dtype=jnp.bfloat16)
        self.wh = jnp.concatenate([jnp.asarray(w2, jnp.float32),
                                   jnp.asarray(w3, jnp.float32)], axis=1)
        self.grad_accum_every = grad_accum_every
        self.validate_every = validate_every
        self.print_every = print_every
        self.steps = 0.0

    # -------- data-pipeline helpers (run off the hot path) --------

    @staticmethod
    def pad(seq, yr):
        """Pad a pre-stacked (M, F)/(M, 2) pair to an MXU-friendly row count."""
        n_rows = seq.shape[0]
        m_pad, tm = _pick_tiling(n_rows)
        if m_pad != n_rows:
            seq = jnp.pad(seq, ((0, m_pad - n_rows), (0, 0)))
            yr = jnp.pad(yr, ((0, m_pad - n_rows), (0, 0)))
        return seq, yr, n_rows, tm

    @staticmethod
    def prepare(micro_batches):
        """Fallback: stack a list of (seq, target, read_value) micro-batches."""
        sizes = {b[0].shape[0] for b in micro_batches}
        assert len(sizes) == 1, (
            "stacked mean equals the per-micro-batch accumulation "
            "(sum_i mean_i / grad_accum_every) only for equal micro-batch sizes")
        seq = jnp.concatenate([b[0] for b in micro_batches], axis=0).astype(jnp.bfloat16)
        yr = jnp.concatenate(
            [jnp.concatenate([b[1], b[2]], axis=1) for b in micro_batches],
            axis=0).astype(jnp.float32)
        return TrainerForward.pad(seq, yr)

    # -------- forward --------

    def forward(self, train_data, valid_data=None):
        curr_step = int(self.steps)
        seq, yr, n_rows, tm = train_data

        log = {}
        if curr_step % self.validate_every == 0 and valid_data is not None:
            vseq, vyr, vn, vtm = valid_data
            loss, aux, total, vloss, vacc = train_and_valid_step(
                seq, yr, vseq, vyr, self.w1, self.wh,
                n_train_rows=n_rows, n_valid_rows=vn,
                tm_train=tm, tm_valid=vtm)
            log = accum_log(log, {'loss': loss, 'aux_loss': aux,
                                  'total_loss': total,
                                  'valid_loss': vloss,
                                  'valid_accuracy': vacc})
            # Validation steps are rare (every validate_every); the host sync
            # for printing here matches the reference and costs little.
            print(f"{curr_step} loss: {float(log['total_loss'])}")
            print(f"{curr_step} valid loss: {float(log['valid_loss'])}")
            print(f"{curr_step} valid accuracy: {float(log['valid_accuracy'])}")
            # TODO(synk): torch.save checkpoint omitted.
        else:
            loss, aux, total = train_step(seq, yr, self.w1, self.wh,
                                          n_rows=n_rows, tm=tm)
            log = accum_log(log, {'loss': loss, 'aux_loss': aux,
                                  'total_loss': total})
            # Perf: no per-step device->host sync; values stay device arrays
            # and are only converted for printing every `print_every` steps.
            if self.print_every and curr_step % self.print_every == 0:
                print(f"{curr_step} loss: {float(log['total_loss'])}")

        # TODO(synk): .backward() / grad clipping / optimizer.step omitted.
        self.steps += 1
        return log


# ----------------------------- main -------------------------------------------

def make_stacked_batch(key, n_rows, seq_len, dna_dim):
    """Data-pipeline stand-in: hands over pre-stacked, pre-padded, final-dtype
    arrays (bf16 one-hot seq; packed f32 [target | read_value])."""
    k1, k2, k3 = jax.random.split(key, 3)
    tokens = jax.random.randint(k1, (n_rows, seq_len), 0, dna_dim)
    seq = jax.nn.one_hot(tokens, dna_dim, dtype=jnp.bfloat16).reshape(
        n_rows, seq_len * dna_dim)
    target = jax.random.bernoulli(k2, 0.5, (n_rows, 1)).astype(jnp.float32)
    read_value = jax.random.uniform(k3, (n_rows, 1), dtype=jnp.float32)
    yr = jnp.concatenate([target, read_value], axis=1)          # packed (M, 2)
    return TrainerForward.pad(seq, yr)


if __name__ == "__main__":
    B, L, DNA, H = 8, 16, 4, 128
    F = L * DNA          # 64 flattened one-hot features
    GA = 2               # grad_accum_every micro-batches, stacked by the pipeline

    key = jax.random.PRNGKey(0)
    kw1, kw2, kw3, kt, kv = jax.random.split(key, 5)
    w1 = jax.random.normal(kw1, (F, H), dtype=jnp.float32) * 0.1
    w2 = jax.random.normal(kw2, (H, 1), dtype=jnp.float32) * 0.1
    w3 = jax.random.normal(kw3, (H, 1), dtype=jnp.float32) * 0.1

    # Pipeline builds the stacked (GA*B, F) slabs once, in final dtype/layout.
    train_data = make_stacked_batch(kt, GA * B, L, DNA)
    valid_data = make_stacked_batch(kv, GA * B, L, DNA)

    trainer = TrainerForward((w1, w2, w3), grad_accum_every=GA,
                             validate_every=250)
    log = trainer.forward(train_data, valid_data)

    # block on the device results
    jax.block_until_ready([v for v in log.values()])

    assert all(k in log for k in
               ('loss', 'aux_loss', 'total_loss', 'valid_loss', 'valid_accuracy'))
    print("KERNEL_OK")
</pallas_src>

<mosaic_0001>
module attributes {stable_mosaic.version = 11 : i64} {
  func.func @stats_kernel(%arg0: i32, %arg1: memref<128x64xbf16, #tpu.memory_space<vmem>>, %arg2: memref<128x2xf32, #tpu.memory_space<vmem>>, %arg3: memref<64x128xbf16, #tpu.memory_space<vmem>>, %arg4: memref<128x2xf32, #tpu.memory_space<vmem>>, %arg5: memref<1x128xf32, #tpu.memory_space<vmem>>) attributes {dimension_semantics = [#tpu.dimension_semantics<parallel>], iteration_bounds = array<i64: 1>, scalar_prefetch = 0 : i64, scratch_operands = 0 : i64, tpu.core_type = #tpu.core_type<tc>, window_params = [{transform_indices = @transform_0, window_bounds = array<i64: 128, 64>}, {transform_indices = @transform_1, window_bounds = array<i64: 128, 2>}, {pipeline_mode = #tpu.pipeline_mode<synchronous>, transform_indices = @transform_2, window_bounds = array<i64: 64, 128>}, {pipeline_mode = #tpu.pipeline_mode<synchronous>, transform_indices = @transform_3, window_bounds = array<i64: 128, 2>}, {transform_indices = @transform_4, window_bounds = array<i64: 1, 128>}]} {
    %c0 = arith.constant 0 : index
    %c0_0 = arith.constant 0 : index
    %0 = vector.load %arg1[%c0, %c0_0] : memref<128x64xbf16, #tpu.memory_space<vmem>>, vector<128x64xbf16>
    %c0_1 = arith.constant 0 : index
    %c0_2 = arith.constant 0 : index
    %1 = vector.load %arg3[%c0_1, %c0_2] : memref<64x128xbf16, #tpu.memory_space<vmem>>, vector<64x128xbf16>
    %cst = arith.constant dense<0.000000e+00> : vector<128x128xf32>
    %2 = tpu.matmul %0, %1, %cst {dimension_numbers = #tpu.dot_dimension_numbers<[1], [0], [0], [1], [0, 0, 1, 1], [], []>} : vector<128x64xbf16>, vector<64x128xbf16>, vector<128x128xf32> -> vector<128x128xf32>
    %cst_3 = arith.constant 0.000000e+00 : f32
    %3 = vector.broadcast %cst_3 : f32 to vector<128x128xf32>
    %4 = arith.maximumf %2, %3 : vector<128x128xf32>
    %c0_4 = arith.constant 0 : index
    %c0_5 = arith.constant 0 : index
    %5 = vector.load %arg4[%c0_4, %c0_5] : memref<128x2xf32, #tpu.memory_space<vmem>>, vector<128x2xf32>
    %cst_6 = arith.constant dense<0.000000e+00> : vector<128x2xf32>
    %6 = tpu.matmul %4, %5, %cst_6 {dimension_numbers = #tpu.dot_dimension_numbers<[1], [0], [0], [1], [0, 0, 1, 1], [], []>} : vector<128x128xf32>, vector<128x2xf32>, vector<128x2xf32> -> vector<128x2xf32>
    %c0_7 = arith.constant 0 : index
    %c0_8 = arith.constant 0 : index
    %7 = vector.load %arg2[%c0_7, %c0_8] : memref<128x2xf32, #tpu.memory_space<vmem>>, vector<128x2xf32>
    %c128_i32 = arith.constant 128 : i32
    %8 = arith.muli %arg0, %c128_i32 : i32
    %9 = tpu.iota {dimensions = array<i32: 0>} : vector<128x2xi32>
    %10 = vector.broadcast %8 : i32 to vector<128x2xi32>
    %11 = arith.addi %9, %10 : vector<128x2xi32>
    %12 = tpu.iota {dimensions = array<i32: 1>} : vector<128x2xi32>
    %c16_i32 = arith.constant 16 : i32
    %13 = vector.broadcast %c16_i32 : i32 to vector<128x2xi32>
    %14 = arith.cmpi slt, %11, %13 : vector<128x2xi32>
    %cst_9 = arith.constant 0.000000e+00 : f32
    %15 = vector.broadcast %cst_9 : f32 to vector<128x2xf32>
    %16 = arith.maximumf %6, %15 : vector<128x2xf32>
    %17 = arith.mulf %6, %7 : vector<128x2xf32>
    %18 = arith.subf %16, %17 : vector<128x2xf32>
    %19 = math.absf %6 : vector<128x2xf32>
    %cst_10 = arith.constant 0.000000e+00 : f32
    %20 = vector.broadcast %cst_10 : f32 to vector<128x2xf32>
    %21 = arith.subf %20, %19 : vector<128x2xf32>
    %22 = math.exp %21 : vector<128x2xf32>
    %23 = math.log1p %22 : vector<128x2xf32>
    %24 = arith.addf %18, %23 : vector<128x2xf32>
    %25 = arith.subf %6, %7 : vector<128x2xf32>
    %26 = arith.mulf %25, %25 : vector<128x2xf32>
    %cst_11 = arith.constant 0.000000e+00 : f32
    %27 = vector.broadcast %cst_11 : f32 to vector<128x2xf32>
    %28 = arith.cmpf ogt, %6, %27 : vector<128x2xf32>
    %cst_12 = arith.constant 5.000000e-01 : f32
    %29 = vector.broadcast %cst_12 : f32 to vector<128x2xf32>
    %30 = arith.cmpf ogt, %7, %29 : vector<128x2xf32>
    %31 = arith.xori %28, %30 : vector<128x2xi1>
    %cst_13 = arith.constant dense<true> : vector<128x2xi1>
    %32 = arith.xori %31, %cst_13 : vector<128x2xi1>
    %33 = arith.extui %32 : vector<128x2xi1> to vector<128x2xi32>
    %34 = arith.sitofp %33 : vector<128x2xi32> to vector<128x2xf32>
    %cst_14 = arith.constant 0.000000e+00 : f32
    %35 = vector.broadcast %cst_14 : f32 to vector<128x2xf32>
    %c0_i32 = arith.constant 0 : i32
    %36 = vector.broadcast %c0_i32 : i32 to vector<128x2xi32>
    %37 = arith.cmpi eq, %12, %36 : vector<128x2xi32>
    %38 = arith.andi %14, %37 : vector<128x2xi1>
    %39 = arith.select %38, %24, %35 : vector<128x2xi1>, vector<128x2xf32>
    %40 = vector.shape_cast %39 : vector<128x2xf32> to vector<1x128x2xf32>
    %cst_15 = arith.constant dense<0.000000e+00> : vector<1xf32>
    %41 = vector.multi_reduction <add>, %40, %cst_15 [1, 2] : vector<1x128x2xf32> to vector<1xf32>
    %42 = vector.shape_cast %41 : vector<1xf32> to vector<1x1x1xf32>
    %43 = vector.extract %42[0, 0, 0] : f32 from vector<1x1x1xf32>
    %c1_i32 = arith.constant 1 : i32
    %44 = vector.broadcast %c1_i32 : i32 to vector<128x2xi32>
    %45 = arith.cmpi eq, %12, %44 : vector<128x2xi32>
    %46 = arith.andi %14, %45 : vector<128x2xi1>
    %47 = arith.select %46, %26, %35 : vector<128x2xi1>, vector<128x2xf32>
    %48 = vector.shape_cast %47 : vector<128x2xf32> to vector<1x128x2xf32>
    %cst_16 = arith.constant dense<0.000000e+00> : vector<1xf32>
    %49 = vector.multi_reduction <add>, %48, %cst_16 [1, 2] : vector<1x128x2xf32> to vector<1xf32>
    %50 = vector.shape_cast %49 : vector<1xf32> to vector<1x1x1xf32>
    %51 = vector.extract %50[0, 0, 0] : f32 from vector<1x1x1xf32>
    %c0_i32_17 = arith.constant 0 : i32
    %52 = vector.broadcast %c0_i32_17 : i32 to vector<128x2xi32>
    %53 = arith.cmpi eq, %12, %52 : vector<128x2xi32>
    %54 = arith.andi %14, %53 : vector<128x2xi1>
    %55 = arith.select %54, %34, %35 : vector<128x2xi1>, vector<128x2xf32>
    %56 = vector.shape_cast %55 : vector<128x2xf32> to vector<1x128x2xf32>
    %cst_18 = arith.constant dense<0.000000e+00> : vector<1xf32>
    %57 = vector.multi_reduction <add>, %56, %cst_18 [1, 2] : vector<1x128x2xf32> to vector<1xf32>
    %58 = vector.shape_cast %57 : vector<1xf32> to vector<1x1x1xf32>
    %59 = vector.extract %58[0, 0, 0] : f32 from vector<1x1x1xf32>
    %60 = tpu.iota {dimensions = array<i32: 1>} : vector<1x128xi32>
    %c0_i32_19 = arith.constant 0 : i32
    %61 = vector.broadcast %c0_i32_19 : i32 to vector<1x128xi32>
    %62 = arith.cmpi eq, %60, %61 : vector<1x128xi32>
    %c1_i32_20 = arith.constant 1 : i32
    %63 = vector.broadcast %c1_i32_20 : i32 to vector<1x128xi32>
    %64 = arith.cmpi eq, %60, %63 : vector<1x128xi32>
    %c2_i32 = arith.constant 2 : i32
    %65 = vector.broadcast %c2_i32 : i32 to vector<1x128xi32>
    %66 = arith.cmpi eq, %60, %65 : vector<1x128xi32>
    %cst_21 = arith.constant 0.000000e+00 : f32
    %67 = vector.broadcast %59 : f32 to vector<1x128xf32>
    %68 = vector.broadcast %cst_21 : f32 to vector<1x128xf32>
    %69 = arith.select %66, %67, %68 : vector<1x128xi1>, vector<1x128xf32>
    %70 = vector.broadcast %51 : f32 to vector<1x128xf32>
    %71 = arith.select %64, %70, %69 : vector<1x128xi1>, vector<1x128xf32>
    %72 = vector.broadcast %43 : f32 to vector<1x128xf32>
    %73 = arith.select %62, %72, %71 : vector<1x128xi1>, vector<1x128xf32>
    %c0_22 = arith.constant 0 : index
    %c0_23 = arith.constant 0 : index
    %74 = vector.load %arg5[%c0_22, %c0_23] : memref<1x128xf32, #tpu.memory_space<vmem>>, vector<1x128xf32>
    tpu.vector_store %arg5[%c0_22, %c0_23], %73 {strides = array<i32>} : memref<1x128xf32, #tpu.memory_space<vmem>>, vector<1x128xf32>,
    return
  }
  func.func @transform_0(%arg0: i32) -> (i32, i32) {
    %c0_i32 = arith.constant 0 : i32
    %c0_i32_0 = arith.constant 0 : i32
    return %arg0, %c0_i32 : i32, i32
  }
  func.func @transform_1(%arg0: i32) -> (i32, i32) {
    %c0_i32 = arith.constant 0 : i32
    %c0_i32_0 = arith.constant 0 : i32
    return %arg0, %c0_i32 : i32, i32
  }
  func.func @transform_2(%arg0: i32) -> (i32, i32) {
    %c0_i32 = arith.constant 0 : i32
    %c0_i32_0 = arith.constant 0 : i32
    %c0_i32_1 = arith.constant 0 : i32
    return %c0_i32, %c0_i32_0 : i32, i32
  }
  func.func @transform_3(%arg0: i32) -> (i32, i32) {
    %c0_i32 = arith.constant 0 : i32
    %c0_i32_0 = arith.constant 0 : i32
    %c0_i32_1 = arith.constant 0 : i32
    return %c0_i32, %c0_i32_0 : i32, i32
  }
  func.func @transform_4(%arg0: i32) -> (i32, i32) {
    %c0_i32 = arith.constant 0 : i32
    %c0_i32_0 = arith.constant 0 : i32
    return %arg0, %c0_i32 : i32, i32
  }
}

</mosaic_0001>

<bundles_post_ra>
// kernel: train_and_valid_step.2
= control target key start
LH: loop header
LB: loop body
LE: loop exit
PB: predicated region body
PF: predicated region fallthrough
CT: control target
= control target key end

     0   :  { %vm106_vm0 = vcmask 523264   ;;  %v456_v60 = vlaneseq  ;;  %vm1309_vm7 = vmmov 1   ;;  %vm907_vm11 = vcmask 15360   ;;  %s1488_s2 = inlined_call_operand.vmem [shape: bf16[64,128], index: 2, kind: input, shape index: {}]   ;;  %s1489_s0 = inlined_call_operand.vmem [shape: bf16[128,64], index: 0, kind: input, shape index: {}]   ;;  %s1490_s3 = inlined_call_operand.vmem [shape: f32[128,2], index: 3, kind: input, shape index: {}]   ;;  %s1491_s1 = inlined_call_operand.vmem [shape: f32[128,2], index: 1, kind: input, shape index: {}]   ;;  %s1492_s4 = inlined_call_operand.vmem [shape: f32[1,128], index: 4, kind: output, shape index: {}]  }
   0x1   :  { %v1289_v0 = vld [vmem:[%s1488_s2 + $0x18] sm:$0xff]   ;;  %v1290_v1 = vld [vmem:[%s1488_s2 + $0x10] sm:$0xff]   ;;  %v1291_v2 = vld [vmem:[%s1488_s2 + $0x8] sm:$0xff]  }
   0x2   :  { %1169 = vmatprep.subr.bf16.mxu0 %v1289_v0  ;;  %v1293_v3 = vld [vmem:[%s1489_s0] sm:$0xff]   ;;  %v259_v5 = vld [vmem:[%s1490_s3 + $0x78] sm:$0xff]  ;;  %v258_v6 = vld [vmem:[%s1490_s3 + $0x70] sm:$0xff]  ;;  %v1438_v63 = vand.u32 127, %v456_v60 }
   0x3   :  { %1170 = vmatpush3.bf16.msra.mxu0 %v1289_v0  ;;  %1177 = vmatprep.mubr.msk.bf16.mxu0 %vm106_vm0, %v1293_v3  ;;  %v1292_v4 = vld [vmem:[%s1488_s2] sm:$0xff]   ;;  %v257_v7 = vld [vmem:[%s1490_s3 + $0x68] sm:$0xff]  ;;  %v1295_v10 = vld [vmem:[%s1489_s0 + $0x10] sm:$0xff]  }
   0x4   :  { %1171 = vmatprep.subr.bf16.mxu0 %v1290_v1  ;;  %1249 = vmatprep.subr.mxu1 %v259_v5  ;;  %v1294_v8 = vld [vmem:[%s1489_s0 + $0x8] sm:$0xff]   ;;  %v256_v9 = vld [vmem:[%s1490_s3 + $0x60] sm:$0xff]  ;;  %v255_v11 = vld [vmem:[%s1490_s3 + $0x58] sm:$0xff]  ;;  %vm874_vm5 = vcmp.eq.s32.totalorder %v1438_v63, 0  ;;  %vm948_vm14 = vcmp.eq.s32.totalorder %v1438_v63, 1  ;;  %vm1077_vm15 = vcmp.eq.s32.totalorder %v1438_v63, 2 }
   0x5   :  { %1265 = vmatpush3.msra.mxu1 %v259_v5  ;;  %v254_v12 = vld [vmem:[%s1490_s3 + $0x50] sm:$0xff]  ;;  %v253_v13 = vld [vmem:[%s1490_s3 + $0x48] sm:$0xff]  ;;  %v1296_v14 = vld [vmem:[%s1489_s0 + $0x18] sm:$0xff]  }
   0x6   :  { %1250 = vmatprep.subr.mxu1 %v258_v6  ;;  %v1297_v15 = vld [vmem:[%s1489_s0 + $0x20] sm:$0xff]   ;;  %v251_v17 = vld [vmem:[%s1490_s3 + $0x38] sm:$0xff]  ;;  %v250_v18 = vld [vmem:[%s1490_s3 + $0x30] sm:$0xff] }
   0x7   :  { %1172 = vmatpush3.bf16.msra.mxu0 %v1290_v1  ;;  %1266 = vmatpush3.msra.mxu1 %v258_v6  ;;  %v252_v16 = vld [vmem:[%s1490_s3 + $0x40] sm:$0xff]  ;;  %v1298_v19 = vld [vmem:[%s1489_s0 + $0x28] sm:$0xff]   ;;  %v1299_v20 = vld [vmem:[%s1489_s0 + $0x30] sm:$0xff]  }
   0x8   :  { %1173 = vmatprep.subr.bf16.mxu0 %v1291_v2  ;;  %1251 = vmatprep.subr.mxu1 %v257_v7  ;;  %v249_v21 = vld [vmem:[%s1490_s3 + $0x28] sm:$0xff]  ;;  %v248_v22 = vld [vmem:[%s1490_s3 + $0x20] sm:$0xff]  ;;  %v1300_v23 = vld [vmem:[%s1489_s0 + $0x38] sm:$0xff]  }
   0x9   :  { %1267 = vmatpush3.msra.mxu1 %v257_v7  ;;  %v247_v24 = vld [vmem:[%s1490_s3 + $0x18] sm:$0xff]  ;;  %v246_v25 = vld [vmem:[%s1490_s3 + $0x10] sm:$0xff]  ;;  %v245_v26 = vld [vmem:[%s1490_s3 + $0x8] sm:$0xff] }
   0xa   :  { %1252 = vmatprep.subr.mxu1 %v256_v9  ;;  %v244_v27 = vld [vmem:[%s1490_s3] sm:$0xff]  ;;  %v1431_v61 = vld [vmem:[%s1491_s1 + $0x8] sm:$0xff] }
   0xb   :  { %1174 = vmatpush3.bf16.msra.mxu0 %v1291_v2  ;;  %1268 = vmatpush3.msra.mxu1 %v256_v9  ;;  %v1436_v62 = vld [vmem:[%s1491_s1] sm:$0xff]  ;;  %vm795_vm1 = vcmp.gt.f32.partialorder %v1431_v61, 0.5 }
   0xc   :  { %1175 = vmatprep.subr.bf16.mxu0 %v1292_v4  ;;  %1253 = vmatprep.subr.mxu1 %v255_v11  ;;  %vm794_vm3 = vcmp.gt.f32.partialorder %v1436_v62, 0.5 }
   0xd   :  { %1269 = vmatpush3.msra.mxu1 %v255_v11 }
   0xe   :  { %1254 = vmatprep.subr.mxu1 %v254_v12 }
   0xf   :  { %1176 = vmatpush3.bf16.msra.mxu0 %v1292_v4  ;;  %1270 = vmatpush3.msra.mxu1 %v254_v12 }
  0x10   :  { %1193 = vmatprep.subr.mxu0 %v259_v5  ;;  %1255 = vmatprep.subr.mxu1 %v253_v13 }
  0x11   :  { %1271 = vmatpush3.msra.mxu1 %v253_v13 }
  0x12   :  { %1178 = vmatmul.mubr.msk.bf16.vlgmr.msra.gmra.mxu0 %vm106_vm0, %v1294_v8  ;;  %1256 = vmatprep.subr.mxu1 %v252_v16 }
  0x13   :  { %1181 = vmatprep.mubr.msk.bf16.mxu0 %vm106_vm0, %v1295_v10  ;;  %1194 = vmatpush3.msra.mxu0 %v259_v5 }
  0x14   :  { %1195 = vmatprep.subr.mxu0 %v258_v6  ;;  %1272 = vmatpush3.msra.mxu1 %v252_v16 }
  0x15   :  { %1196 = vmatpush3.msra.mxu0 %v258_v6  ;;  %1257 = vmatprep.subr.mxu1 %v251_v17  ;;  %v1310_v6 = vmov 0.0  }
  0x16   :  { %1197 = vmatprep.subr.mxu0 %v257_v7  ;;  %1273 = vmatpush3.msra.mxu1 %v251_v17 }
  0x17   :  { %1198 = vmatpush3.msra.mxu0 %v257_v7  ;;  %1258 = vmatprep.subr.mxu1 %v250_v18 }
  0x18   :  { %1199 = vmatprep.subr.mxu0 %v256_v9  ;;  %1274 = vmatpush3.msra.mxu1 %v250_v18 }
  0x19   :  { %1200 = vmatpush3.msra.mxu0 %v256_v9  ;;  %1259 = vmatprep.subr.mxu1 %v249_v21 }
  0x1a   :  { %1182 = vmatmul.mubr.msk.bf16.gmra.mxu0 %vm106_vm0, %v1296_v14  ;;  %1201 = vmatprep.subr.mxu0 %v255_v11 }
  0x1b   :  { %1185 = vmatprep.mubr.msk.bf16.mxu0 %vm106_vm0, %v1297_v15  ;;  %1202 = vmatpush3.msra.mxu0 %v255_v11 }
  0x1c   :  { %1203 = vmatprep.subr.mxu0 %v254_v12  ;;  %1275 = vmatpush3.msra.mxu1 %v249_v21 }
  0x1d   :  { %1204 = vmatpush3.msra.mxu0 %v254_v12  ;;  %1260 = vmatprep.subr.mxu1 %v248_v22 }
  0x1e   :  { %1205 = vmatprep.subr.mxu0 %v253_v13  ;;  %1276 = vmatpush3.msra.mxu1 %v248_v22 }
  0x1f   :  { %1206 = vmatpush3.msra.mxu0 %v253_v13  ;;  %1261 = vmatprep.subr.mxu1 %v247_v24 }
  0x20   :  { %1207 = vmatprep.subr.mxu0 %v252_v16  ;;  %1277 = vmatpush3.msra.mxu1 %v247_v24 }
  0x21   :  { %1208 = vmatpush3.msra.mxu0 %v252_v16  ;;  %1262 = vmatprep.subr.mxu1 %v246_v25 }
  0x22   :  { %1186 = vmatmul.mubr.msk.bf16.gmra.mxu0 %vm106_vm0, %v1298_v19  ;;  %1209 = vmatprep.subr.mxu0 %v251_v17 }
  0x23   :  { %1189 = vmatprep.mubr.msk.bf16.mxu0 %vm106_vm0, %v1299_v20  ;;  %1210 = vmatpush3.msra.mxu0 %v251_v17 }
  0x24   :  { %1211 = vmatprep.subr.mxu0 %v250_v18  ;;  %1278 = vmatpush3.msra.mxu1 %v246_v25 }
  0x25   :  { %1212 = vmatpush3.msra.mxu0 %v250_v18  ;;  %1263 = vmatprep.subr.mxu1 %v245_v26 }
  0x26   :  { %1213 = vmatprep.subr.mxu0 %v249_v21  ;;  %1279 = vmatpush3.msra.mxu1 %v245_v26 }
  0x27   :  { %1214 = vmatpush3.msra.mxu0 %v249_v21  ;;  %1264 = vmatprep.subr.mxu1 %v244_v27 }
  0x28   :  { %1215 = vmatprep.subr.mxu0 %v248_v22  ;;  %1280 = vmatpush3.msra.mxu1 %v244_v27 }
  0x29   :  { %1216 = vmatpush3.msra.mxu0 %v248_v22 }
  0x2a   :  { %1190 = vmatmul.mubr.msk.bf16.gmra.mxu0 %vm106_vm0, %v1300_v23  ;;  %1217 = vmatprep.subr.mxu0 %v247_v24 }
  0x2b   :  { %1218 = vmatpush3.msra.mxu0 %v247_v24 }
  0x2c   :  { %1219 = vmatprep.subr.mxu0 %v246_v25 }
  0x2d   :  { %1220 = vmatpush3.msra.mxu0 %v246_v25 }
  0x2e   :  { %1221 = vmatprep.subr.mxu0 %v245_v26 }
  0x2f   :  { %1222 = vmatpush3.msra.mxu0 %v245_v26 }
  0x30   :  { %1223 = vmatprep.subr.mxu0 %v244_v27 }
  0x31   :  { %1224 = vmatpush3.msra.mxu0 %v244_v27 }
  0xd2   :  { %v1179_v28 = vpop.f32.mrf.mxu0 }
  0xd3   :  { %v230_v34 = vmax.f32 %v1179_v28, 0.0 }
  0xd4   :  { %v165_v29 = vpop.f32.mrf.mxu0 }
  0xd5   :  { %v228_v30 = vmax.f32 %v165_v29, 0.0 }
  0xd6   :  { %v1180_v31 = vpop.f32.mrf.mxu0 }
  0xd7   :  { %1225 = vmatprep.mubr.f32.mxu0 %v228_v30  ;;  %v231_v37 = vmax.f32 %v1180_v31, 0.0 }
  0xd8   :  { %v168_v32 = vpop.f32.mrf.mxu0 }
  0xd9   :  { %v229_v33 = vmax.f32 %v168_v32, 0.0 }
  0xda   :  { %v1183_v35 = vpop.f32.mrf.mxu0 }
  0xdb   :  { %1226 = vmatmul.mubr.f32.vlgmr.msra.gmra.mxu0 %v229_v33  ;;  %v234_v40 = vmax.f32 %v1183_v35, 0.0 }
  0xdc   :  { %1228 = vmatprep.mubr.f32.mxu0 %v230_v34  ;;  %v181_v36 = vpop.f32.mrf.mxu0 }
  0xdd   :  { %v232_v38 = vmax.f32 %v181_v36, 0.0 }
  0xde   :  { %v1184_v39 = vpop.f32.mrf.mxu0 }
  0xdf   :  { %1229 = vmatmul.mubr.f32.gmra.mxu0 %v231_v37  ;;  %1231 = vmatprep.mubr.f32.mxu1 %v232_v38  ;;  %v235_v44 = vmax.f32 %v1184_v39, 0.0 }
  0xe0   :  { %v184_v41 = vpop.f32.mrf.mxu0 }
  0xe1   :  { %v233_v42 = vmax.f32 %v184_v41, 0.0 }
  0xe2   :  { %v1187_v43 = vpop.f32.mrf.mxu0 }
  0xe3   :  { %1232 = vmatmul.mubr.f32.vlgmr.msra.gmra.mxu1 %v233_v42  ;;  %v238_v48 = vmax.f32 %v1187_v43, 0.0 }
  0xe4   :  { %v197_v45 = vpop.f32.mrf.mxu0  ;;  %1234 = vmatprep.mubr.f32.mxu1 %v234_v40 }
  0xe5   :  { %v236_v46 = vmax.f32 %v197_v45, 0.0 }
  0xe6   :  { %v1188_v47 = vpop.f32.mrf.mxu0 }
  0xe7   :  { %1235 = vmatmul.mubr.f32.gmra.mxu1 %v235_v44  ;;  %v239_v52 = vmax.f32 %v1188_v47, 0.0 }
  0xe8   :  { %v200_v49 = vpop.f32.mrf.mxu0  ;;  %1237 = vmatprep.mubr.f32.mxu1 %v236_v46 }
  0xe9   :  { %v237_v50 = vmax.f32 %v200_v49, 0.0 }
  0xea   :  { %v1191_v51 = vpop.f32.mrf.mxu0 }
  0xeb   :  { %1238 = vmatmul.mubr.f32.gmra.mxu1 %v237_v50  ;;  %v242_v56 = vmax.f32 %v1191_v51, 0.0 }
  0xec   :  { %v213_v53 = vpop.f32.mrf.mxu0  ;;  %1240 = vmatprep.mubr.f32.mxu1 %v238_v48 }
  0xed   :  { %v240_v54 = vmax.f32 %v213_v53, 0.0 }
  0xee   :  { %v1192_v55 = vpop.f32.mrf.mxu0 }
  0xef   :  { %1241 = vmatmul.mubr.f32.gmra.mxu1 %v239_v52  ;;  %v243_v59 = vmax.f32 %v1192_v55, 0.0 }
  0xf0   :  { %v216_v57 = vpop.f32.mrf.mxu0  ;;  %1243 = vmatprep.mubr.f32.mxu1 %v240_v54 }
  0xf1   :  { %v241_v58 = vmax.f32 %v216_v57, 0.0 }
  0xf3   :  { %1244 = vmatmul.mubr.f32.gmra.mxu1 %v241_v58 }
  0xf4   :  { %1246 = vmatprep.mubr.f32.mxu1 %v242_v56 }
  0xf7   :  { %1247 = vmatmul.mubr.f32.gmra.mxu1 %v243_v59 }
 0x19b   :  { %v1441_v0 = vpop.f32.mrf.mxu0 }
 0x19c   :  { %v523_v1 = vand.u32 2147483647, %v1441_v0  ;;  %vm779_vm2 = vcmp.gt.f32.partialorder %v1441_v0, 0.0  ;;  %v475_v37 = vmax.f32 %v1441_v0, 0.0  ;;  %v491_v38 = vmul.f32 %v1441_v0, %v1431_v61 }
 0x19d   :  { %v1446_v2 = vpop.f32.mrf.mxu0  ;;  %vm811_vm4 = vmxor %vm779_vm2, %vm795_vm1  ;;  %v747_v50 = vsub.f32 %v1441_v0, %v1431_v61 }
 0x19e   :  { %v539_v3 = vsub.f32 0.0, %v523_v1  ;;  %v522_v4 = vand.u32 2147483647, %v1446_v2  ;;  %vm778_vm6 = vcmp.gt.f32.partialorder %v1446_v2, 0.0  ;;  %vm827_vm8 = vmxor %vm811_vm4, %vm1309_vm7  ;;  %v474_v42 = vmax.f32 %v1446_v2, 0.0 }
 0x19f   :  { %v1230_v5 = vpop.f32.mrf.mxu0  ;;  %vm810_vm9 = vmxor %vm778_vm6, %vm794_vm3  ;;  %v1110_v7 = vsel %vm827_vm8, 1.0, %v1310_v6  ;;  %v490_v43 = vmul.f32 %v1436_v62, %v1446_v2  ;;  %v746_v45 = vsub.f32 %v1446_v2, %v1436_v62  ;;  %v507_v49 = vsub.f32 %v475_v37, %v491_v38 }
 0x1a0   :  { %v556_v8 = vmul.f32 1.442695, %v539_v3  ;;  %v538_v9 = vsub.f32 0.0, %v522_v4  ;;  %vm826_vm10 = vmxor %vm810_vm9, %vm1309_vm7  ;;  %v1022_v10 = vsel %vm874_vm5, %v1110_v7, 0.0  ;;  %v763_v60 = vmul.f32 %v747_v50, %v747_v50 }
 0x1a1   :  { %v336_v11 = vpop.f32.mrf.mxu0  ;;  %v1109_v12 = vsel %vm826_vm10, 1.0, %v1310_v6  ;;  %v1038_v16 = vsel %vm907_vm11, %v1022_v10, 0.0  ;;  %v506_v54 = vsub.f32 %v474_v42, %v490_v43  ;;  %v762_v56 = vmul.f32 %v746_v45, %v746_v45 }
 0x1a2   :  { %1301 = vpow2.f32 %v556_v8  ;;  %v554_v13 = vmul.f32 1.442695, %v538_v9  ;;  %v1021_v14 = vsel %vm874_vm5, %v1109_v12, 0.0  ;;  %v966_v3 = vsel %vm948_vm14, %v763_v60, 0.0 }
 0x1a3   :  { %v1037_v15 = vsel %vm907_vm11, %v1021_v14, 0.0  ;;  %v1233_v17 = vpop.f32.mrf.mxu1  ;;  %v965_v61 = vsel %vm948_vm14, %v762_v56, 0.0  ;;  %v982_v5 = vsel %vm907_vm11, %v966_v3, 0.0 }
 0x1a4   :  { %1303 = vpow2.f32 %v554_v13  ;;  %v1039_v18 = vadd.f32 %v1038_v16, %v1037_v15  ;;  %v981_v4 = vsel %vm907_vm11, %v965_v61, 0.0 }
 0x1a5   :  { %v346_v19 = vpop.f32.mrf.mxu1  ;;  %v983_v6 = vadd.f32 %v982_v5, %v981_v4 }
 0x1a6   :  { %1068 = vadd.xlane.f32.xlu1 %v1039_v18 }
 0x1a7   :  { %v1236_v20 = vpop.f32.mrf.mxu1 }
 0x1a9   :  { %v356_v21 = vpop.f32.mrf.mxu1 }
 0x1ab   :  { %v1239_v22 = vpop.f32.mrf.mxu1 }
 0x1ad   :  { %v366_v23 = vpop.f32.mrf.mxu1 }
 0x1af   :  { %v1302_v24 = vpop.eup %1301  ;;  %v1242_v25 = vpop.f32.mrf.mxu1 }
 0x1b0   :  { %v595_v26 = vadd.f32 1.0, %v1302_v24  ;;  %v598_v33 = vmul.f32 -0.5, %v1302_v24  ;;  %v601_v39 = vand.u32 2147483647, %v1302_v24 }
 0x1b1   :  { %v1304_v27 = vpop.eup %1303  ;;  %v376_v28 = vpop.f32.mrf.mxu1 }
 0x1b2   :  { %v586_v29 = vadd.f32 1.0, %v1304_v27  ;;  %1305 = vlog2.f32 %v595_v26  ;;  %v589_v35 = vmul.f32 -0.5, %v1304_v27  ;;  %v599_v36 = vadd.f32 1.0, %v598_v33 }
 0x1b3   :  { %v1245_v30 = vpop.f32.mrf.mxu1  ;;  %v592_v44 = vand.u32 2147483647, %v1304_v27  ;;  %vm602_vm12 = vcmp.lt.f32.partialorder %v601_v39, 0.0004427343 }
 0x1b4   :  { %1307 = vlog2.f32 %v586_v29  ;;  %v590_v40 = vadd.f32 1.0, %v589_v35  ;;  %v600_v47 = vmul.f32 %v1302_v24, %v599_v36 }
 0x1b5   :  { %v386_v31 = vpop.f32.mrf.mxu1  ;;  %vm593_vm13 = vcmp.lt.f32.partialorder %v592_v44, 0.0004427343 }
 0x1b6   :  { %v591_v52 = vmul.f32 %v1304_v27, %v590_v40 }
 0x1b7   :  { %v1248_v32 = vpop.f32.mrf.mxu1 }
 0x1b9   :  { %v396_v34 = vpop.f32.mrf.mxu1 }
 0x1bf   :  { %v1306_v41 = vpop.eup %1305 }
 0x1c0   :  { %v597_v46 = vmul.f32 0.6931472, %v1306_v41 }
 0x1c1   :  { %v1308_v48 = vpop.eup %1307 }
 0x1c2   :  { %v588_v51 = vmul.f32 0.6931472, %v1308_v48  ;;  %v603_v53 = vsel %vm602_vm12, %v600_v47, %v597_v46 }
 0x1c3   :  { %v731_v55 = vadd.f32 %v603_v53, %v507_v49 }
 0x1c4   :  { %v594_v57 = vsel %vm593_vm13, %v591_v52, %v588_v51 }
 0x1c5   :  { %v730_v58 = vadd.f32 %v594_v57, %v506_v54  ;;  %v892_v59 = vsel %vm874_vm5, %v731_v55, 0.0 }
 0x1c6   :  { %v909_v1 = vsel %vm907_vm11, %v892_v59, 0.0 }
 0x1c7   :  { %v891_v62 = vsel %vm874_vm5, %v730_v58, 0.0 }
 0x1c8   :  { %v908_v0 = vsel %vm907_vm11, %v891_v62, 0.0 }
 0x1c9   :  { %v910_v2 = vadd.f32 %v909_v1, %v908_v0 }
 0x1cb   :  { %939 = vadd.xlane.f32.xlu0 %v910_v2 }
 0x1cf   :  { %1012 = vadd.xlane.f32.xlu0 %v983_v6 }
 0x22f   :  { %v1069_v7 = vpop.xlane.xlu1 %1068 }
 0x230   :  { %v1070_v8 = vrot.slane %v1069_v7, 4 }
 0x232   :  { %v1071_v9 = vadd.f32 %v1070_v8, %v1069_v7 }
 0x234   :  { %v1072_v13 = vrot.slane %v1071_v9, 2 }
 0x236   :  { %v1073_v19 = vadd.f32 %v1072_v13, %v1071_v9 }
 0x238   :  { %v1074_v24 = vrot.slane %v1073_v19, 1 }
 0x23a   :  { %v1075_v27 = vadd.f32 %v1074_v24, %v1073_v19 }
 0x254   :  { %v940_v10 = vpop.xlane.xlu0 %939 }
 0x255   :  { %v941_v11 = vrot.slane %v940_v10, 4 }
 0x257   :  { %v942_v12 = vadd.f32 %v941_v11, %v940_v10 }
 0x258   :  { %v1013_v14 = vpop.xlane.xlu0 %1012 }
 0x259   :  { %v943_v15 = vrot.slane %v942_v12, 2  ;;  %v1014_v16 = vrot.slane %v1013_v14, 4 }
 0x25b   :  { %v1015_v17 = vadd.f32 %v1014_v16, %v1013_v14  ;;  %v944_v18 = vadd.f32 %v943_v15, %v942_v12 }
 0x25d   :  { %v1016_v20 = vrot.slane %v1015_v17, 2  ;;  %v945_v21 = vrot.slane %v944_v18, 1 }
 0x25f   :  { %v1017_v22 = vadd.f32 %v1016_v20, %v1015_v17  ;;  %v946_v23 = vadd.f32 %v945_v21, %v944_v18 }
 0x261   :  { %1281 = vpush %v946_v23  ;;  %v1018_v25 = vrot.slane %v1017_v22, 1 }
 0x263   :  { %v1019_v26 = vadd.f32 %v1018_v25, %v1017_v22 }
 0x265   :  { %1283 = vpush %v1019_v26 }
 0x266   :  { %1285 = vpush %v1075_v27 }
 0x292   :  { %s1282_s1 = spop %1281 }
 0x293   :  { %v1082_v31 = vstv %s1282_s1 }
 0x296   :  { %s1284_s19 = spop %1283 }
 0x297   :  { %v1080_v28 = vstv %s1284_s19  ;;  %s1286_s20 = spop %1285 }
 0x298   :  { %v1078_v29 = vstv %s1286_s20 }
 0x299   :  { %v1079_v30 = vsel %vm1077_vm15, %v1078_v29, 0.0 }
 0x29a   :  { %v1081_v32 = vsel %vm948_vm14, %v1080_v28, %v1079_v30 }
 0x29b   :  { %v1083_v33 = vsel %vm874_vm5, %v1082_v31, %v1081_v32 }
 0x29c   :  { %1084 = vst [vmem:[%s1492_s4] sm:$0x1] %v1083_v33 }

</bundles_post_ra>
